<compile_context>
chip_gen: v7x
topology: tpu7x:2x2x1
jax: 0.10.0
libtpu: 0.0.40
codegen_flags: <defaults>
</compile_context>

<pallas_src>
import math
import functools

import jax
import jax.numpy as jnp
from jax.experimental import pallas as pl
from jax.experimental.pallas import tpu as pltpu

# ----------------------------- model config ---------------------------------
EMBED_DIM = 32      # embedding_dim
FFN_DIM = 64        # ffn_embedding_dim
NUM_HEADS = 4       # num_attention_heads
HEAD_DIM = EMBED_DIM // NUM_HEADS
LN_EPS = 1e-5       # PyTorch LayerNorm default


def _layer_norm(x, gamma, beta):
    mean = jnp.mean(x, axis=-1, keepdims=True)
    var = jnp.mean(jnp.square(x - mean), axis=-1, keepdims=True)
    inv = jax.lax.rsqrt(var + LN_EPS)
    return (x - mean) * inv * gamma + beta


def _encoder_layer_kernel(
    x_ref,      # (T*B, D)   rows in (t, b) order -- fairseq layout, flattened
    w_ref,      # (D, 3D + D + F + F) = wq|wk|wv | wo | fc1 | fc2^T  (lanes)
    vec_ref,    # (8, 128)   rows: bqkv, bo, ln1_g, ln1_b, b1, b2, ln2_g, ln2_b
    o_ref,      # (T*B, D)
    *, batch, num_heads, scaling,
):
    TB, D = x_ref.shape
    HD = D // num_heads
    F = (w_ref.shape[1] - 4 * D) // 2
    c_qkv, c_wo, c_w1, c_w2t = 0, 3 * D, 4 * D, 4 * D + F

    x = x_ref[...]                                          # (TB, D) f32

    # ---- fused Q|K|V projection: one MXU push on the whole slab ----
    qkv = (jnp.dot(x, w_ref[:, c_qkv:c_qkv + 3 * D],
                   preferred_element_type=jnp.float32)
           + vec_ref[0:1, 0:3 * D])
    q = qkv[:, 0:D] * scaling            # fairseq: q = q_proj(x); q *= scaling
    k = qkv[:, D:2 * D]
    v = qkv[:, 2 * D:3 * D]

    # ---- additive same-batch mask (rows are (t, b)-interleaved) ----
    rb = jax.lax.broadcasted_iota(jnp.int32, (TB, TB), 0) % batch
    cb = jax.lax.broadcasted_iota(jnp.int32, (TB, TB), 1) % batch
    mask_bias = jnp.where(rb == cb, jnp.float32(0.0), jnp.float32(-1e30))

    # ---- per-head attention over the full slab; context folded straight ----
    # ---- into the output projection (no reshapes, no concat)            ----
    attn_out = None
    for h in range(num_heads):
        lo = h * HD
        qh = q[:, lo:lo + HD]                               # (TB, HD)
        kh = k[:, lo:lo + HD]
        vh = v[:, lo:lo + HD]
        s = jnp.einsum("td,sd->ts", qh, kh,
                       preferred_element_type=jnp.float32) + mask_bias
        s = s - jnp.max(s, axis=-1, keepdims=True)
        p = jnp.exp(s)
        p = p / jnp.sum(p, axis=-1, keepdims=True)          # exact division
        ctx = jnp.dot(p, vh, preferred_element_type=jnp.float32)   # (TB, HD)
        part = jnp.dot(ctx, w_ref[lo:lo + HD, c_wo:c_wo + D],
                       preferred_element_type=jnp.float32)         # (TB, D)
        attn_out = part if attn_out is None else attn_out + part
    attn_out = attn_out + vec_ref[1:2, 0:D]

    # ---- residual + self_attn_layer_norm (post-LN path) ----
    h1 = _layer_norm(x + attn_out, vec_ref[2:3, 0:D], vec_ref[3:4, 0:D])

    # ---- FFN: relu(fc1) -> fc2 (fc2 stored pre-transposed: contract lanes) --
    f = (jnp.dot(h1, w_ref[:, c_w1:c_w1 + F],
                 preferred_element_type=jnp.float32) + vec_ref[4:5, 0:F])
    f = jnp.maximum(f, 0.0)
    f = (jnp.einsum("tf,df->td", f, w_ref[:, c_w2t:c_w2t + F],
                    preferred_element_type=jnp.float32) + vec_ref[5:6, 0:D])

    # ---- residual + final_layer_norm ----
    o_ref[...] = _layer_norm(h1 + f, vec_ref[6:7, 0:D], vec_ref[7:8, 0:D])


def transformer_sentence_encoder_layer(x_tbc, params):
    """x_tbc: (T, B, C) float32, fairseq layout. Returns ((T, B, C), None)."""
    T, B, D = x_tbc.shape
    F = params["w1"].shape[1]

    # One lane-dense weight slab: wq|wk|wv | wo | fc1 | fc2^T  -> (D, 4D + 2F)
    w_main = jnp.concatenate(
        [params["wq"], params["wk"], params["wv"],
         params["wo"], params["w1"], params["w2"].T], axis=1)

    # One (8, 128) slab for every bias / LayerNorm vector.
    def _row(vec):
        return jnp.pad(vec, (0, 128 - vec.shape[0]))
    vecs = jnp.stack([
        _row(jnp.concatenate([params["bq"], params["bk"], params["bv"]])),
        _row(params["bo"]),
        _row(params["ln1_g"]), _row(params["ln1_b"]),
        _row(params["b1"]), _row(params["b2"]),
        _row(params["ln2_g"]), _row(params["ln2_b"]),
    ])

    x_slab = x_tbc.reshape(T * B, D)        # (t, b) row order; no transpose

    kernel = functools.partial(
        _encoder_layer_kernel,
        batch=B, num_heads=NUM_HEADS, scaling=1.0 / math.sqrt(HEAD_DIM))

    vmem_spec = pl.BlockSpec(memory_space=pltpu.MemorySpace.VMEM)
    out = pl.pallas_call(
        kernel,
        out_shape=jax.ShapeDtypeStruct((T * B, D), jnp.float32),
        in_specs=[vmem_spec, vmem_spec, vmem_spec],
        out_specs=vmem_spec,
    )(x_slab, w_main, vecs)

    # attn weights: None (need_weights=False), matching fairseq inference path.
    # TODO(synk): dropout layers are identity (eval mode), so not emitted.
    return out.reshape(T, B, D), None


# ------------------------------ reference -----------------------------------
def _reference(x_tbc, params):
    x = jnp.transpose(x_tbc, (1, 0, 2))            # (B, T, D)
    scaling = 1.0 / math.sqrt(HEAD_DIM)

    def ln(y, g, b):
        m = jnp.mean(y, axis=-1, keepdims=True)
        v = jnp.mean(jnp.square(y - m), axis=-1, keepdims=True)
        return (y - m) / jnp.sqrt(v + LN_EPS) * g + b

    q = (x @ params["wq"] + params["bq"]) * scaling
    k = x @ params["wk"] + params["bk"]
    v = x @ params["wv"] + params["bv"]
    B, T, D = x.shape
    qh = q.reshape(B, T, NUM_HEADS, HEAD_DIM).transpose(0, 2, 1, 3)
    kh = k.reshape(B, T, NUM_HEADS, HEAD_DIM).transpose(0, 2, 1, 3)
    vh = v.reshape(B, T, NUM_HEADS, HEAD_DIM).transpose(0, 2, 1, 3)
    s = jnp.einsum("bhtd,bhsd->bhts", qh, kh)
    p = jax.nn.softmax(s, axis=-1)
    ctx = jnp.einsum("bhts,bhsd->bhtd", p, vh).transpose(0, 2, 1, 3).reshape(B, T, D)
    attn_out = ctx @ params["wo"] + params["bo"]
    h1 = ln(x + attn_out, params["ln1_g"], params["ln1_b"])
    f = jnp.maximum(h1 @ params["w1"] + params["b1"], 0.0)
    f = f @ params["w2"] + params["b2"]
    h2 = ln(h1 + f, params["ln2_g"], params["ln2_b"])
    return jnp.transpose(h2, (1, 0, 2))


# ------------------------------ param init ----------------------------------
def make_params(key):
    keys = jax.random.split(key, 12)
    s_d = 1.0 / math.sqrt(EMBED_DIM)
    s_f = 1.0 / math.sqrt(FFN_DIM)
    # Linear weights stored pre-transposed to (in, out); biases / LN params 1-D.
    return {
        "wq": jax.random.uniform(keys[0], (EMBED_DIM, EMBED_DIM), jnp.float32, -s_d, s_d),
        "bq": jax.random.uniform(keys[1], (EMBED_DIM,), jnp.float32, -s_d, s_d),
        "wk": jax.random.uniform(keys[2], (EMBED_DIM, EMBED_DIM), jnp.float32, -s_d, s_d),
        "bk": jax.random.uniform(keys[3], (EMBED_DIM,), jnp.float32, -s_d, s_d),
        "wv": jax.random.uniform(keys[4], (EMBED_DIM, EMBED_DIM), jnp.float32, -s_d, s_d),
        "bv": jax.random.uniform(keys[5], (EMBED_DIM,), jnp.float32, -s_d, s_d),
        "wo": jax.random.uniform(keys[6], (EMBED_DIM, EMBED_DIM), jnp.float32, -s_d, s_d),
        "bo": jax.random.uniform(keys[7], (EMBED_DIM,), jnp.float32, -s_d, s_d),
        "ln1_g": jnp.ones((EMBED_DIM,), jnp.float32),
        "ln1_b": jnp.zeros((EMBED_DIM,), jnp.float32),
        "w1": jax.random.uniform(keys[8], (EMBED_DIM, FFN_DIM), jnp.float32, -s_d, s_d),
        "b1": jax.random.uniform(keys[9], (FFN_DIM,), jnp.float32, -s_d, s_d),
        "w2": jax.random.uniform(keys[10], (FFN_DIM, EMBED_DIM), jnp.float32, -s_f, s_f),
        "b2": jax.random.uniform(keys[11], (EMBED_DIM,), jnp.float32, -s_f, s_f),
        "ln2_g": jnp.ones((EMBED_DIM,), jnp.float32),
        "ln2_b": jnp.zeros((EMBED_DIM,), jnp.float32),
    }


if __name__ == "__main__":
    key = jax.random.PRNGKey(0)
    k_x, k_p = jax.random.split(key)

    T, B = 8, 2                                     # seq=8, batch=2, embed=32
    x = jax.random.normal(k_x, (T, B, EMBED_DIM), dtype=jnp.float32)
    params = make_params(k_p)

    out, attn = transformer_sentence_encoder_layer(x, params)
    out = jax.block_until_ready(out)

    ref = _reference(x, params)
    assert out.shape == (T, B, EMBED_DIM)
    assert attn is None
    # Exact softmax division (no EUP approx reciprocal) -> tighter tolerance
    # than the previous version; small slack left for MXU accumulation-order
    # differences between the kernel and the XLA reference.
    assert jnp.allclose(out, ref, atol=1e-3, rtol=1e-3), "mismatch vs JAX reference"

    print("KERNEL_OK")
</pallas_src>

<mosaic_0001>
module attributes {stable_mosaic.version = 11 : i64} {
  func.func @_encoder_layer_kernel(%arg0: memref<16x32xf32, #tpu.memory_space<vmem>>, %arg1: memref<32x256xf32, #tpu.memory_space<vmem>>, %arg2: memref<8x128xf32, #tpu.memory_space<vmem>>, %arg3: memref<16x32xf32, #tpu.memory_space<vmem>>) attributes {dimension_semantics = [], scalar_prefetch = 0 : i64, scratch_operands = 0 : i64, tpu.core_type = #tpu.core_type<tc>} {
    %c0 = arith.constant 0 : index
    %c0_0 = arith.constant 0 : index
    %0 = vector.load %arg0[%c0, %c0_0] : memref<16x32xf32, #tpu.memory_space<vmem>>, vector<16x32xf32>
    %c0_1 = arith.constant 0 : index
    %c0_2 = arith.constant 0 : index
    %1 = vector.load %arg1[%c0_1, %c0_2] : memref<32x256xf32, #tpu.memory_space<vmem>>, vector<32x96xf32>
    %cst = arith.constant dense<0.000000e+00> : vector<16x96xf32>
    %2 = tpu.matmul %0, %1, %cst {dimension_numbers = #tpu.dot_dimension_numbers<[1], [0], [0], [1], [0, 0, 1, 1], [], []>} : vector<16x32xf32>, vector<32x96xf32>, vector<16x96xf32> -> vector<16x96xf32>
    %c0_3 = arith.constant 0 : index
    %c0_4 = arith.constant 0 : index
    %3 = vector.load %arg2[%c0_3, %c0_4] : memref<8x128xf32, #tpu.memory_space<vmem>>, vector<1x96xf32>
    %4 = vector.broadcast %3 : vector<1x96xf32> to vector<16x96xf32>
    %5 = arith.addf %2, %4 : vector<16x96xf32>
    %6 = vector.extract_strided_slice %5 {offsets = [0, 0], sizes = [16, 32], strides = [1, 1]} : vector<16x96xf32> to vector<16x32xf32>
    %cst_5 = arith.constant 0.353553385 : f32
    %7 = vector.broadcast %cst_5 : f32 to vector<16x32xf32>
    %8 = arith.mulf %6, %7 : vector<16x32xf32>
    %9 = vector.extract_strided_slice %5 {offsets = [0, 32], sizes = [16, 32], strides = [1, 1]} : vector<16x96xf32> to vector<16x32xf32>
    %10 = vector.extract_strided_slice %5 {offsets = [0, 64], sizes = [16, 32], strides = [1, 1]} : vector<16x96xf32> to vector<16x32xf32>
    %11 = tpu.iota {dimensions = array<i32: 0>} : vector<16x16xi32>
    %c2_i32 = arith.constant 2 : i32
    %c0_i32 = arith.constant 0 : i32
    %12 = arith.cmpi eq, %c2_i32, %c0_i32 : i32
    %c1_i32 = arith.constant 1 : i32
    %13 = arith.select %12, %c1_i32, %c2_i32 : i32
    %14 = vector.broadcast %13 : i32 to vector<16x16xi32>
    %15 = arith.remsi %11, %14 : vector<16x16xi32>
    %c0_i32_6 = arith.constant 0 : i32
    %16 = vector.broadcast %c0_i32_6 : i32 to vector<16x16xi32>
    %17 = arith.cmpi ne, %15, %16 : vector<16x16xi32>
    %c0_i32_7 = arith.constant 0 : i32
    %18 = vector.broadcast %c0_i32_7 : i32 to vector<16x16xi32>
    %19 = arith.cmpi slt, %15, %18 : vector<16x16xi32>
    %c0_i32_8 = arith.constant 0 : i32
    %20 = arith.cmpi slt, %13, %c0_i32_8 : i32
    %21 = vector.broadcast %20 : i1 to vector<16x16xi1>
    %22 = vector.broadcast %21 : vector<16x16xi1> to vector<16x16xi1>
    %23 = arith.xori %19, %22 : vector<16x16xi1>
    %24 = arith.andi %23, %17 : vector<16x16xi1>
    %25 = vector.broadcast %13 : i32 to vector<16x16xi32>
    %26 = arith.addi %15, %25 : vector<16x16xi32>
    %27 = arith.select %24, %26, %15 : vector<16x16xi1>, vector<16x16xi32>
    %28 = tpu.iota {dimensions = array<i32: 1>} : vector<16x16xi32>
    %c2_i32_9 = arith.constant 2 : i32
    %c0_i32_10 = arith.constant 0 : i32
    %29 = arith.cmpi eq, %c2_i32_9, %c0_i32_10 : i32
    %c1_i32_11 = arith.constant 1 : i32
    %30 = arith.select %29, %c1_i32_11, %c2_i32_9 : i32
    %31 = vector.broadcast %30 : i32 to vector<16x16xi32>
    %32 = arith.remsi %28, %31 : vector<16x16xi32>
    %c0_i32_12 = arith.constant 0 : i32
    %33 = vector.broadcast %c0_i32_12 : i32 to vector<16x16xi32>
    %34 = arith.cmpi ne, %32, %33 : vector<16x16xi32>
    %c0_i32_13 = arith.constant 0 : i32
    %35 = vector.broadcast %c0_i32_13 : i32 to vector<16x16xi32>
    %36 = arith.cmpi slt, %32, %35 : vector<16x16xi32>
    %c0_i32_14 = arith.constant 0 : i32
    %37 = arith.cmpi slt, %30, %c0_i32_14 : i32
    %38 = vector.broadcast %37 : i1 to vector<16x16xi1>
    %39 = vector.broadcast %38 : vector<16x16xi1> to vector<16x16xi1>
    %40 = arith.xori %36, %39 : vector<16x16xi1>
    %41 = arith.andi %40, %34 : vector<16x16xi1>
    %42 = vector.broadcast %30 : i32 to vector<16x16xi32>
    %43 = arith.addi %32, %42 : vector<16x16xi32>
    %44 = arith.select %41, %43, %32 : vector<16x16xi1>, vector<16x16xi32>
    %45 = arith.cmpi eq, %27, %44 : vector<16x16xi32>
    %cst_15 = arith.constant 0.000000e+00 : f32
    %cst_16 = arith.constant -1.000000e+30 : f32
    %46 = vector.broadcast %cst_15 : f32 to vector<16x16xf32>
    %47 = vector.broadcast %cst_16 : f32 to vector<16x16xf32>
    %48 = arith.select %45, %46, %47 : vector<16x16xi1>, vector<16x16xf32>
    %49 = vector.extract_strided_slice %8 {offsets = [0, 0], sizes = [16, 8], strides = [1, 1]} : vector<16x32xf32> to vector<16x8xf32>
    %50 = vector.extract_strided_slice %9 {offsets = [0, 0], sizes = [16, 8], strides = [1, 1]} : vector<16x32xf32> to vector<16x8xf32>
    %51 = vector.extract_strided_slice %10 {offsets = [0, 0], sizes = [16, 8], strides = [1, 1]} : vector<16x32xf32> to vector<16x8xf32>
    "tpu.trace_start"() <{level = 10 : i32, message = "td,sd->ts"}> : () -> ()
    %cst_17 = arith.constant dense<0.000000e+00> : vector<16x16xf32>
    %52 = tpu.matmul %49, %50, %cst_17 {dimension_numbers = #tpu.dot_dimension_numbers<[1], [1], [0], [0], [0, 0, 1, 0], [], []>} : vector<16x8xf32>, vector<16x8xf32>, vector<16x16xf32> -> vector<16x16xf32>
    "tpu.trace_stop"() : () -> ()
    %53 = arith.addf %52, %48 : vector<16x16xf32>
    %cst_18 = arith.constant dense<0xFF800000> : vector<16xf32>
    %54 = vector.multi_reduction <maximumf>, %53, %cst_18 [1] : vector<16x16xf32> to vector<16xf32>
    %55 = vector.shape_cast %54 : vector<16xf32> to vector<16x1xf32>
    %56 = vector.broadcast %55 : vector<16x1xf32> to vector<16x16xf32>
    %57 = arith.subf %53, %56 : vector<16x16xf32>
    %58 = math.exp %57 : vector<16x16xf32>
    %cst_19 = arith.constant dense<0.000000e+00> : vector<16xf32>
    %59 = vector.multi_reduction <add>, %58, %cst_19 [1] : vector<16x16xf32> to vector<16xf32>
    %60 = vector.shape_cast %59 : vector<16xf32> to vector<16x1xf32>
    %61 = vector.broadcast %60 : vector<16x1xf32> to vector<16x16xf32>
    %62 = arith.divf %58, %61 : vector<16x16xf32>
    %cst_20 = arith.constant dense<0.000000e+00> : vector<16x8xf32>
    %63 = tpu.matmul %62, %51, %cst_20 {dimension_numbers = #tpu.dot_dimension_numbers<[1], [0], [0], [1], [0, 0, 1, 1], [], []>} : vector<16x16xf32>, vector<16x8xf32>, vector<16x8xf32> -> vector<16x8xf32>
    %c0_21 = arith.constant 0 : index
    %c96 = arith.constant 96 : index
    %64 = vector.load %arg1[%c0_21, %c96] : memref<32x256xf32, #tpu.memory_space<vmem>>, vector<8x32xf32>
    %cst_22 = arith.constant dense<0.000000e+00> : vector<16x32xf32>
    %65 = tpu.matmul %63, %64, %cst_22 {dimension_numbers = #tpu.dot_dimension_numbers<[1], [0], [0], [1], [0, 0, 1, 1], [], []>} : vector<16x8xf32>, vector<8x32xf32>, vector<16x32xf32> -> vector<16x32xf32>
    %66 = vector.extract_strided_slice %8 {offsets = [0, 8], sizes = [16, 8], strides = [1, 1]} : vector<16x32xf32> to vector<16x8xf32>
    %67 = vector.extract_strided_slice %9 {offsets = [0, 8], sizes = [16, 8], strides = [1, 1]} : vector<16x32xf32> to vector<16x8xf32>
    %68 = vector.extract_strided_slice %10 {offsets = [0, 8], sizes = [16, 8], strides = [1, 1]} : vector<16x32xf32> to vector<16x8xf32>
    "tpu.trace_start"() <{level = 10 : i32, message = "td,sd->ts"}> : () -> ()
    %cst_23 = arith.constant dense<0.000000e+00> : vector<16x16xf32>
    %69 = tpu.matmul %66, %67, %cst_23 {dimension_numbers = #tpu.dot_dimension_numbers<[1], [1], [0], [0], [0, 0, 1, 0], [], []>} : vector<16x8xf32>, vector<16x8xf32>, vector<16x16xf32> -> vector<16x16xf32>
    "tpu.trace_stop"() : () -> ()
    %70 = arith.addf %69, %48 : vector<16x16xf32>
    %cst_24 = arith.constant dense<0xFF800000> : vector<16xf32>
    %71 = vector.multi_reduction <maximumf>, %70, %cst_24 [1] : vector<16x16xf32> to vector<16xf32>
    %72 = vector.shape_cast %71 : vector<16xf32> to vector<16x1xf32>
    %73 = vector.broadcast %72 : vector<16x1xf32> to vector<16x16xf32>
    %74 = arith.subf %70, %73 : vector<16x16xf32>
    %75 = math.exp %74 : vector<16x16xf32>
    %cst_25 = arith.constant dense<0.000000e+00> : vector<16xf32>
    %76 = vector.multi_reduction <add>, %75, %cst_25 [1] : vector<16x16xf32> to vector<16xf32>
    %77 = vector.shape_cast %76 : vector<16xf32> to vector<16x1xf32>
    %78 = vector.broadcast %77 : vector<16x1xf32> to vector<16x16xf32>
    %79 = arith.divf %75, %78 : vector<16x16xf32>
    %cst_26 = arith.constant dense<0.000000e+00> : vector<16x8xf32>
    %80 = tpu.matmul %79, %68, %cst_26 {dimension_numbers = #tpu.dot_dimension_numbers<[1], [0], [0], [1], [0, 0, 1, 1], [], []>} : vector<16x16xf32>, vector<16x8xf32>, vector<16x8xf32> -> vector<16x8xf32>
    %c8 = arith.constant 8 : index
    %c96_27 = arith.constant 96 : index
    %81 = vector.load %arg1[%c8, %c96_27] : memref<32x256xf32, #tpu.memory_space<vmem>>, vector<8x32xf32>
    %cst_28 = arith.constant dense<0.000000e+00> : vector<16x32xf32>
    %82 = tpu.matmul %80, %81, %cst_28 {dimension_numbers = #tpu.dot_dimension_numbers<[1], [0], [0], [1], [0, 0, 1, 1], [], []>} : vector<16x8xf32>, vector<8x32xf32>, vector<16x32xf32> -> vector<16x32xf32>
    %83 = arith.addf %65, %82 : vector<16x32xf32>
    %84 = vector.extract_strided_slice %8 {offsets = [0, 16], sizes = [16, 8], strides = [1, 1]} : vector<16x32xf32> to vector<16x8xf32>
    %85 = vector.extract_strided_slice %9 {offsets = [0, 16], sizes = [16, 8], strides = [1, 1]} : vector<16x32xf32> to vector<16x8xf32>
    %86 = vector.extract_strided_slice %10 {offsets = [0, 16], sizes = [16, 8], strides = [1, 1]} : vector<16x32xf32> to vector<16x8xf32>
    "tpu.trace_start"() <{level = 10 : i32, message = "td,sd->ts"}> : () -> ()
    %cst_29 = arith.constant dense<0.000000e+00> : vector<16x16xf32>
    %87 = tpu.matmul %84, %85, %cst_29 {dimension_numbers = #tpu.dot_dimension_numbers<[1], [1], [0], [0], [0, 0, 1, 0], [], []>} : vector<16x8xf32>, vector<16x8xf32>, vector<16x16xf32> -> vector<16x16xf32>
    "tpu.trace_stop"() : () -> ()
    %88 = arith.addf %87, %48 : vector<16x16xf32>
    %cst_30 = arith.constant dense<0xFF800000> : vector<16xf32>
    %89 = vector.multi_reduction <maximumf>, %88, %cst_30 [1] : vector<16x16xf32> to vector<16xf32>
    %90 = vector.shape_cast %89 : vector<16xf32> to vector<16x1xf32>
    %91 = vector.broadcast %90 : vector<16x1xf32> to vector<16x16xf32>
    %92 = arith.subf %88, %91 : vector<16x16xf32>
    %93 = math.exp %92 : vector<16x16xf32>
    %cst_31 = arith.constant dense<0.000000e+00> : vector<16xf32>
    %94 = vector.multi_reduction <add>, %93, %cst_31 [1] : vector<16x16xf32> to vector<16xf32>
    %95 = vector.shape_cast %94 : vector<16xf32> to vector<16x1xf32>
    %96 = vector.broadcast %95 : vector<16x1xf32> to vector<16x16xf32>
    %97 = arith.divf %93, %96 : vector<16x16xf32>
    %cst_32 = arith.constant dense<0.000000e+00> : vector<16x8xf32>
    %98 = tpu.matmul %97, %86, %cst_32 {dimension_numbers = #tpu.dot_dimension_numbers<[1], [0], [0], [1], [0, 0, 1, 1], [], []>} : vector<16x16xf32>, vector<16x8xf32>, vector<16x8xf32> -> vector<16x8xf32>
    %c16 = arith.constant 16 : index
    %c96_33 = arith.constant 96 : index
    %99 = vector.load %arg1[%c16, %c96_33] : memref<32x256xf32, #tpu.memory_space<vmem>>, vector<8x32xf32>
    %cst_34 = arith.constant dense<0.000000e+00> : vector<16x32xf32>
    %100 = tpu.matmul %98, %99, %cst_34 {dimension_numbers = #tpu.dot_dimension_numbers<[1], [0], [0], [1], [0, 0, 1, 1], [], []>} : vector<16x8xf32>, vector<8x32xf32>, vector<16x32xf32> -> vector<16x32xf32>
    %101 = arith.addf %83, %100 : vector<16x32xf32>
    %102 = vector.extract_strided_slice %8 {offsets = [0, 24], sizes = [16, 8], strides = [1, 1]} : vector<16x32xf32> to vector<16x8xf32>
    %103 = vector.extract_strided_slice %9 {offsets = [0, 24], sizes = [16, 8], strides = [1, 1]} : vector<16x32xf32> to vector<16x8xf32>
    %104 = vector.extract_strided_slice %10 {offsets = [0, 24], sizes = [16, 8], strides = [1, 1]} : vector<16x32xf32> to vector<16x8xf32>
    "tpu.trace_start"() <{level = 10 : i32, message = "td,sd->ts"}> : () -> ()
    %cst_35 = arith.constant dense<0.000000e+00> : vector<16x16xf32>
    %105 = tpu.matmul %102, %103, %cst_35 {dimension_numbers = #tpu.dot_dimension_numbers<[1], [1], [0], [0], [0, 0, 1, 0], [], []>} : vector<16x8xf32>, vector<16x8xf32>, vector<16x16xf32> -> vector<16x16xf32>
    "tpu.trace_stop"() : () -> ()
    %106 = arith.addf %105, %48 : vector<16x16xf32>
    %cst_36 = arith.constant dense<0xFF800000> : vector<16xf32>
    %107 = vector.multi_reduction <maximumf>, %106, %cst_36 [1] : vector<16x16xf32> to vector<16xf32>
    %108 = vector.shape_cast %107 : vector<16xf32> to vector<16x1xf32>
    %109 = vector.broadcast %108 : vector<16x1xf32> to vector<16x16xf32>
    %110 = arith.subf %106, %109 : vector<16x16xf32>
    %111 = math.exp %110 : vector<16x16xf32>
    %cst_37 = arith.constant dense<0.000000e+00> : vector<16xf32>
    %112 = vector.multi_reduction <add>, %111, %cst_37 [1] : vector<16x16xf32> to vector<16xf32>
    %113 = vector.shape_cast %112 : vector<16xf32> to vector<16x1xf32>
    %114 = vector.broadcast %113 : vector<16x1xf32> to vector<16x16xf32>
    %115 = arith.divf %111, %114 : vector<16x16xf32>
    %cst_38 = arith.constant dense<0.000000e+00> : vector<16x8xf32>
    %116 = tpu.matmul %115, %104, %cst_38 {dimension_numbers = #tpu.dot_dimension_numbers<[1], [0], [0], [1], [0, 0, 1, 1], [], []>} : vector<16x16xf32>, vector<16x8xf32>, vector<16x8xf32> -> vector<16x8xf32>
    %c24 = arith.constant 24 : index
    %c96_39 = arith.constant 96 : index
    %117 = vector.load %arg1[%c24, %c96_39] : memref<32x256xf32, #tpu.memory_space<vmem>>, vector<8x32xf32>
    %cst_40 = arith.constant dense<0.000000e+00> : vector<16x32xf32>
    %118 = tpu.matmul %116, %117, %cst_40 {dimension_numbers = #tpu.dot_dimension_numbers<[1], [0], [0], [1], [0, 0, 1, 1], [], []>} : vector<16x8xf32>, vector<8x32xf32>, vector<16x32xf32> -> vector<16x32xf32>
    %119 = arith.addf %101, %118 : vector<16x32xf32>
    %c1 = arith.constant 1 : index
    %c0_41 = arith.constant 0 : index
    %120 = vector.load %arg2[%c1, %c0_41] : memref<8x128xf32, #tpu.memory_space<vmem>>, vector<1x32xf32>
    %121 = vector.broadcast %120 : vector<1x32xf32> to vector<16x32xf32>
    %122 = arith.addf %119, %121 : vector<16x32xf32>
    %123 = arith.addf %0, %122 : vector<16x32xf32>
    %c2 = arith.constant 2 : index
    %c0_42 = arith.constant 0 : index
    %124 = vector.load %arg2[%c2, %c0_42] : memref<8x128xf32, #tpu.memory_space<vmem>>, vector<1x32xf32>
    %c3 = arith.constant 3 : index
    %c0_43 = arith.constant 0 : index
    %125 = vector.load %arg2[%c3, %c0_43] : memref<8x128xf32, #tpu.memory_space<vmem>>, vector<1x32xf32>
    %cst_44 = arith.constant dense<0.000000e+00> : vector<16xf32>
    %126 = vector.multi_reduction <add>, %123, %cst_44 [1] : vector<16x32xf32> to vector<16xf32>
    %127 = vector.shape_cast %126 : vector<16xf32> to vector<16x1xf32>
    %cst_45 = arith.constant 3.200000e+01 : f32
    %128 = vector.broadcast %cst_45 : f32 to vector<16x1xf32>
    %129 = arith.divf %127, %128 : vector<16x1xf32>
    %130 = vector.broadcast %129 : vector<16x1xf32> to vector<16x32xf32>
    %131 = arith.subf %123, %130 : vector<16x32xf32>
    %132 = arith.mulf %131, %131 : vector<16x32xf32>
    %cst_46 = arith.constant dense<0.000000e+00> : vector<16xf32>
    %133 = vector.multi_reduction <add>, %132, %cst_46 [1] : vector<16x32xf32> to vector<16xf32>
    %134 = vector.shape_cast %133 : vector<16xf32> to vector<16x1xf32>
    %cst_47 = arith.constant 3.200000e+01 : f32
    %135 = vector.broadcast %cst_47 : f32 to vector<16x1xf32>
    %136 = arith.divf %134, %135 : vector<16x1xf32>
    %cst_48 = arith.constant 9.99999974E-6 : f32
    %137 = vector.broadcast %cst_48 : f32 to vector<16x1xf32>
    %138 = arith.addf %136, %137 : vector<16x1xf32>
    %139 = math.rsqrt %138 : vector<16x1xf32>
    %140 = vector.broadcast %129 : vector<16x1xf32> to vector<16x32xf32>
    %141 = arith.subf %123, %140 : vector<16x32xf32>
    %142 = vector.broadcast %139 : vector<16x1xf32> to vector<16x32xf32>
    %143 = arith.mulf %141, %142 : vector<16x32xf32>
    %144 = vector.broadcast %124 : vector<1x32xf32> to vector<16x32xf32>
    %145 = arith.mulf %143, %144 : vector<16x32xf32>
    %146 = vector.broadcast %125 : vector<1x32xf32> to vector<16x32xf32>
    %147 = arith.addf %145, %146 : vector<16x32xf32>
    %c0_49 = arith.constant 0 : index
    %c128 = arith.constant 128 : index
    %148 = vector.load %arg1[%c0_49, %c128] : memref<32x256xf32, #tpu.memory_space<vmem>>, vector<32x64xf32>
    %cst_50 = arith.constant dense<0.000000e+00> : vector<16x64xf32>
    %149 = tpu.matmul %147, %148, %cst_50 {dimension_numbers = #tpu.dot_dimension_numbers<[1], [0], [0], [1], [0, 0, 1, 1], [], []>} : vector<16x32xf32>, vector<32x64xf32>, vector<16x64xf32> -> vector<16x64xf32>
    %c4 = arith.constant 4 : index
    %c0_51 = arith.constant 0 : index
    %150 = vector.load %arg2[%c4, %c0_51] : memref<8x128xf32, #tpu.memory_space<vmem>>, vector<1x64xf32>
    %151 = vector.broadcast %150 : vector<1x64xf32> to vector<16x64xf32>
    %152 = arith.addf %149, %151 : vector<16x64xf32>
    %cst_52 = arith.constant 0.000000e+00 : f32
    %153 = vector.broadcast %cst_52 : f32 to vector<16x64xf32>
    %154 = arith.maximumf %152, %153 : vector<16x64xf32>
    %c0_53 = arith.constant 0 : index
    %c192 = arith.constant 192 : index
    %155 = vector.load %arg1[%c0_53, %c192] : memref<32x256xf32, #tpu.memory_space<vmem>>, vector<32x64xf32>
    "tpu.trace_start"() <{level = 10 : i32, message = "tf,df->td"}> : () -> ()
    %cst_54 = arith.constant dense<0.000000e+00> : vector<16x32xf32>
    %156 = tpu.matmul %154, %155, %cst_54 {dimension_numbers = #tpu.dot_dimension_numbers<[1], [1], [0], [0], [0, 0, 1, 0], [], []>} : vector<16x64xf32>, vector<32x64xf32>, vector<16x32xf32> -> vector<16x32xf32>
    "tpu.trace_stop"() : () -> ()
    %c5 = arith.constant 5 : index
    %c0_55 = arith.constant 0 : index
    %157 = vector.load %arg2[%c5, %c0_55] : memref<8x128xf32, #tpu.memory_space<vmem>>, vector<1x32xf32>
    %158 = vector.broadcast %157 : vector<1x32xf32> to vector<16x32xf32>
    %159 = arith.addf %156, %158 : vector<16x32xf32>
    %160 = arith.addf %147, %159 : vector<16x32xf32>
    %c6 = arith.constant 6 : index
    %c0_56 = arith.constant 0 : index
    %161 = vector.load %arg2[%c6, %c0_56] : memref<8x128xf32, #tpu.memory_space<vmem>>, vector<1x32xf32>
    %c7 = arith.constant 7 : index
    %c0_57 = arith.constant 0 : index
    %162 = vector.load %arg2[%c7, %c0_57] : memref<8x128xf32, #tpu.memory_space<vmem>>, vector<1x32xf32>
    %cst_58 = arith.constant dense<0.000000e+00> : vector<16xf32>
    %163 = vector.multi_reduction <add>, %160, %cst_58 [1] : vector<16x32xf32> to vector<16xf32>
    %164 = vector.shape_cast %163 : vector<16xf32> to vector<16x1xf32>
    %cst_59 = arith.constant 3.200000e+01 : f32
    %165 = vector.broadcast %cst_59 : f32 to vector<16x1xf32>
    %166 = arith.divf %164, %165 : vector<16x1xf32>
    %167 = vector.broadcast %166 : vector<16x1xf32> to vector<16x32xf32>
    %168 = arith.subf %160, %167 : vector<16x32xf32>
    %169 = arith.mulf %168, %168 : vector<16x32xf32>
    %cst_60 = arith.constant dense<0.000000e+00> : vector<16xf32>
    %170 = vector.multi_reduction <add>, %169, %cst_60 [1] : vector<16x32xf32> to vector<16xf32>
    %171 = vector.shape_cast %170 : vector<16xf32> to vector<16x1xf32>
    %cst_61 = arith.constant 3.200000e+01 : f32
    %172 = vector.broadcast %cst_61 : f32 to vector<16x1xf32>
    %173 = arith.divf %171, %172 : vector<16x1xf32>
    %cst_62 = arith.constant 9.99999974E-6 : f32
    %174 = vector.broadcast %cst_62 : f32 to vector<16x1xf32>
    %175 = arith.addf %173, %174 : vector<16x1xf32>
    %176 = math.rsqrt %175 : vector<16x1xf32>
    %177 = vector.broadcast %166 : vector<16x1xf32> to vector<16x32xf32>
    %178 = arith.subf %160, %177 : vector<16x32xf32>
    %179 = vector.broadcast %176 : vector<16x1xf32> to vector<16x32xf32>
    %180 = arith.mulf %178, %179 : vector<16x32xf32>
    %181 = vector.broadcast %161 : vector<1x32xf32> to vector<16x32xf32>
    %182 = arith.mulf %180, %181 : vector<16x32xf32>
    %183 = vector.broadcast %162 : vector<1x32xf32> to vector<16x32xf32>
    %184 = arith.addf %182, %183 : vector<16x32xf32>
    %c0_63 = arith.constant 0 : index
    %c0_64 = arith.constant 0 : index
    %185 = vector.load %arg3[%c0_63, %c0_64] : memref<16x32xf32, #tpu.memory_space<vmem>>, vector<16x32xf32>
    tpu.vector_store %arg3[%c0_63, %c0_64], %184 {strides = array<i32>} : memref<16x32xf32, #tpu.memory_space<vmem>>, vector<16x32xf32>,
    return
  }
}

</mosaic_0001>

<bundles_post_ra>
// kernel: tpu_custom_call.1
= control target key start
LH: loop header
LB: loop body
LE: loop exit
PB: predicated region body
PF: predicated region fallthrough
CT: control target
= control target key end

     0   :  { %8 = vsyncpa [#allocation3], 0  ;;  %s2399_s0 = inlined_call_operand.hbm [shape: f32[16,32], index: 0, kind: input, shape index: {}]   ;;  %s2400_s1 = inlined_call_operand.hbm [shape: f32[32,256], index: 1, kind: input, shape index: {}]   ;;  %s2401_s2 = inlined_call_operand.hbm [shape: f32[8,128], index: 2, kind: input, shape index: {}]   ;;  %s2402_s3 = inlined_call_operand.hbm [shape: f32[16,32], index: 3, kind: output, shape index: {}]  }
   0x1   :  { %9 = vsyncpa [#allocation6], 0 }
   0x2   :  { %10 = vsyncpa [#allocation4], 0  ;;  %s2155_s12 = smov [#allocation5]   ;;  %s2061_s16 = scalar_lea.hbm %s2400_s1, 1024 }
   0x3   :  { %s28_s13 = sshll.u32 %s2155_s12, 4  ;;  %p2062_p0 = scmp.ne.s32.totalorder %s2400_s1, %s2061_s16  ;;  %s29_s13 = int_to_ptr.vmem [resolvable:$true] %s28_s13 }
   0x4   :  { %p2065_p1 = scmp.lt.u32.totalorder %s2061_s16, %s2400_s1 }
   0x6   :  { %p2067_p2 = pnand %p2065_p1, %p2062_p0 }
   0x8   :  { %2070 = shalt.err (!%p2067_p2)
}
   0x9   :  { %s2071_s21 = scalar_lea.vmem %s29_s13, 1024  ;;  %p2076_p4 = scmp.lt.s32.totalorder %s29_s13, %s29_s13 }
   0xa   :  { %p2072_p3 = scmp.ne.s32.totalorder %s29_s13, %s2071_s21  ;;  %p2077_p5 = scmp.lt.s32.totalorder %s2071_s21, %s2071_s21 }
   0xc   :  { %p2078_p6 = por %p2077_p5, %p2076_p4 }
   0xe   :  { %p2079_p7 = pnand %p2078_p6, %p2072_p3 }
  0x10   :  { %2082 = shalt.err (!%p2079_p7)
}
  0x11   :  { %s2156_s22 = smov 256   ;;  %s2157_s23 = smov 16  }
  0x12   :  { %34 = dma.hbm_to_vmem [thread:$0]  %s2400_s1, 1024, %s29_s13, [#allocation6], %s2156_s22, %s2156_s22, %s2157_s23  }
  0x13   :  { %s2158_s26 = smov [#allocation2]   ;;  %s2083_s30 = scalar_lea.hbm %s2399_s0, 256 }
  0x14   :  { %s16_s27 = sshll.u32 %s2158_s26, 4  ;;  %p2084_p8 = scmp.ne.s32.totalorder %s2399_s0, %s2083_s30  ;;  %s17_s27 = int_to_ptr.vmem [resolvable:$true] %s16_s27 }
  0x15   :  { %p2087_p9 = scmp.lt.u32.totalorder %s2083_s30, %s2399_s0 }
  0x17   :  { %p2089_p10 = pnand %p2087_p9, %p2084_p8 }
  0x19   :  { %2092 = shalt.err (!%p2089_p10)
}
  0x1a   :  { %s2093_s8 = scalar_lea.vmem %s17_s27, 256  ;;  %p2098_p12 = scmp.lt.s32.totalorder %s17_s27, %s17_s27 }
  0x1b   :  { %p2094_p11 = scmp.ne.s32.totalorder %s17_s27, %s2093_s8  ;;  %p2099_p13 = scmp.lt.s32.totalorder %s2093_s8, %s2093_s8 }
  0x1d   :  { %p2100_p0 = por %p2099_p13, %p2098_p12 }
  0x1f   :  { %p2101_p1 = pnand %p2100_p0, %p2094_p11 }
  0x21   :  { %2104 = shalt.err (!%p2101_p1)
}
  0x22   :  { %s2159_s1 = smov 128   ;;  %s2160_s9 = smov 8  }
  0x23   :  { %22 = dma.hbm_to_vmem [thread:$0]  %s2399_s0, 256, %s17_s27, [#allocation3], %s2159_s1, %s2159_s1, %s2160_s9  }
  0x24   :  { %s2161_s12 = smov [#allocation7]   ;;  %s2105_s16 = scalar_lea.hbm %s2401_s2, 128 }
  0x25   :  { %s41_s13 = sshll.u32 %s2161_s12, 4  ;;  %p2106_p2 = scmp.ne.s32.totalorder %s2401_s2, %s2105_s16  ;;  %s42_s13 = int_to_ptr.vmem [resolvable:$true] %s41_s13 }
  0x26   :  { %p2109_p3 = scmp.lt.u32.totalorder %s2105_s16, %s2401_s2 }
  0x28   :  { %p2111_p4 = pnand %p2109_p3, %p2106_p2 }
  0x2a   :  { %2114 = shalt.err (!%p2111_p4)
}
  0x2b   :  { %s2115_s21 = scalar_lea.vmem %s42_s13, 128  ;;  %p2120_p6 = scmp.lt.s32.totalorder %s42_s13, %s42_s13 }
  0x2c   :  { %p2116_p5 = scmp.ne.s32.totalorder %s42_s13, %s2115_s21  ;;  %p2121_p7 = scmp.lt.s32.totalorder %s2115_s21, %s2115_s21 }
  0x2e   :  { %p2122_p8 = por %p2121_p7, %p2120_p6 }
  0x30   :  { %p2123_p9 = pnand %p2122_p8, %p2116_p5 }
  0x32   :  { %2126 = shalt.err (!%p2123_p9)
}
  0x33   :  { %44 = dma.hbm_to_vmem [thread:$0]  %s2401_s2, 128, %s42_s13, [#allocation6]  }
  0x34   :  { %2149 = dma.done.wait [#allocation3], 256  }
  0x35   :  { %2150 = vsyncadd [#allocation3], 4294967040 }
  0x36   :  { %2151 = dma.done.wait [#allocation6], 1152  }
  0x37   :  { %2152 = vsyncadd [#allocation6], 4294966144  ;;  %vm65_vm0 = vcmask 261120   ;;  %v2235_v0 = vld [vmem:[#allocation5] sm:$0xff]  ;;  %v2237_v1 = vld [vmem:[#allocation5 + $0x10] sm:$0xff]  ;;  %vm200_vm1 = vcmask 64512   ;;  %v149_v33 = vlaneseq }
  0x38   :  { %v2239_v2 = vld [vmem:[#allocation5 + $0x20] sm:$0xff]  ;;  %v1876_v3 = vpack.c.bf16 %v2237_v1, %v2235_v0  ;;  %v2243_v4 = vld [vmem:[#allocation5 + $0x30] sm:$0xff]  ;;  %v2251_v7 = vld [vmem:[#allocation2 + $0x8] sm:$0xff]  ;;  %s2162_s2 = smov 96   ;;  %s2163_s23 = smov 120   ;;  %vm286_vm5 = vcmask 130048  }
  0x39   :  { %v2245_v5 = vld [vmem:[#allocation2] sm:$0xff]  ;;  %v1880_v6 = vpack.c.bf16 %v2243_v4, %v2239_v2  ;;  %v1655_v8 = vld [vmem:[#allocation7] ss:$0 sm:$0xff]  ;;  %s2164_s24 = smov 88   ;;  %s2165_s25 = smov 80   ;;  %vm2272_vm2 = vmpackc.low %vm200_vm1, %vm200_vm1  ;;  %v150_v34 = vshrl.u32 %v149_v33, 7 }
  0x3a   :  { %1775 = vmatprep.mubr.msk.f32.mxu1 %vm65_vm0, %v2245_v5  ;;  %1877 = vmatprep.subr.bf16.mxu1 %v1876_v3  ;;  %s2166_s26 = smov 112   ;;  %v177_v36 = vand.u32 127, %v149_v33  ;;  %v2167_v40 = vmov -1e+30   ;;  %s2168_s27 = smov 56   ;;  %vm1503_vm6 = vcmask 523264  }
  0x3b   :  { %1879 = vmatpush3.bf16.msra.mxu1 %v1876_v3  ;;  %v151_v35 = vadd.s32 8, %v150_v34  ;;  %v156_v39 = vand.u32 1, %v150_v34  ;;  %s2169_s28 = smov 72   ;;  %s2170_s29 = smov 64   ;;  %vm1933_vm7 = vmpackc.low %vm1503_vm6, %vm1503_vm6 }
  0x3c   :  { %1881 = vmatprep.subr.bf16.mxu1 %v1880_v6  ;;  %v182_v38 = vand.u32 1, %v177_v36  ;;  %s2171_s30 = smov 104   ;;  %s2172_s4 = smov 32  }
  0x3d   :  { %v163_v37 = vand.u32 1, %v151_v35  ;;  %s2173_s5 = smov 48   ;;  %s2174_s6 = smov 40  }
  0x3e   :  { %vm190_vm4 = vcmp.eq.s32.totalorder %v156_v39, %v182_v38  ;;  %s2175_s7 = smov [#allocation8]  }
  0x3f   :  { %1883 = vmatpush3.bf16.msra.mxu1 %v1880_v6  ;;  %vm191_vm3 = vcmp.eq.s32.totalorder %v163_v37, %v182_v38  ;;  %v2296_v42 = vsel %vm190_vm4, 0.0, %v2167_v40  ;;  %s1642_s8 = sshll.u32 %s2175_s7, 4  ;;  %s1643_s8 = int_to_ptr.vmem [resolvable:$true] %s1642_s8 }
  0x40   :  { %v2294_v41 = vsel %vm191_vm3, 0.0, %v2167_v40  ;;  %s2127_s10 = scalar_lea.vmem %s1643_s8, 256  ;;  %p2132_p11 = scmp.lt.s32.totalorder %s1643_s8, %s1643_s8 }
  0x41   :  { %p2128_p10 = scmp.ne.s32.totalorder %s1643_s8, %s2127_s10  ;;  %p2133_p12 = scmp.lt.s32.totalorder %s2127_s10, %s2127_s10 }
  0x42   :  { %1776 = vmatmul.mubr.msk.f32.vlgmr.msra.gmra.mrb[0].mxu1 %vm65_vm0, %v2251_v7 }
  0x43   :  { %p2134_p13 = por %p2133_p12, %p2132_p11 }
  0x45   :  { %p2135_p0 = pnand %p2134_p13, %p2128_p10 }
 0x115   :  { %v1777_v9 = vpop.f32.mrb[0].mxu1 }
 0x116   :  { %v144_v10 = vadd.f32 %v1777_v9, %v1655_v8  ;;  %v138_v11 = vpop.f32.mrb[1].mxu1 }
 0x117   :  { %v139_v12 = vadd.f32 %v1655_v8, %v138_v11 }
 0x118   :  { %v2263_v15 = vmul.f32 0.35355338, %v144_v10 }
 0x119   :  { %v2255_v13 = vpack.i.bf16 %v144_v10, %v139_v12  ;;  %v2257_v14 = vmul.f32 0.35355338, %v139_v12 }
 0x11b   :  { %1972 = vrot.lane.b32.xlu0 %v2255_v13, %s2162_s2  ;;  %397 = vrot.lane.b32.xlu1 %v2257_v14, %s2163_s23 }
 0x11c   :  { %1782 = vmatprep.mubr.msk.f32.mxu1 %vm200_vm1, %v2257_v14 }
 0x11f   :  { %1977 = vrot.lane.b32.xlu0 %v2255_v13, %s2164_s24  ;;  %399 = vrot.lane.b32.xlu1 %v2263_v15, %s2163_s23 }
 0x123   :  { %1982 = vrot.lane.b32.xlu0 %v2255_v13, %s2165_s25  ;;  %768 = vrot.lane.b32.xlu1 %v2257_v14, %s2166_s26 }
 0x127   :  { %770 = vrot.lane.b32.xlu0 %v2263_v15, %s2166_s26 }
 0x18d   :  { %v1973_v16 = vpop.permute.xlu0 %1972  ;;  %v398_v26 = vpop.permute.xlu1 %397 }
 0x18e   :  { %v1975_v17 = vunpack.i.h.bf16 %v1973_v16  ;;  %v1974_v18 = vunpack.i.l.bf16 %v1973_v16 }
 0x190   :  { %v1884_v20 = vpack.c.bf16 %v1975_v17, %v1974_v18 }
 0x191   :  { %v1978_v21 = vpop.permute.xlu0 %1977  ;;  %v400_v30 = vpop.permute.xlu1 %399 }
 0x192   :  { %v1980_v22 = vunpack.i.h.bf16 %v1978_v21  ;;  %v1979_v23 = vunpack.i.l.bf16 %v1978_v21  ;;  %1886 = vmatprep.subr.msk.bf16.mxu1 %vm2272_vm2, %v1884_v20 }
 0x193   :  { %1889 = vmatpush3.bf16.xpose.msk.msra.mxu1 %vm2272_vm2, %v1884_v20 }
 0x194   :  { %v1894_v24 = vpack.c.bf16 %v1980_v22, %v1979_v23 }
 0x195   :  { %v1983_v25 = vpop.permute.xlu0 %1982  ;;  %v769_v31 = vpop.permute.xlu1 %768 }
 0x196   :  { %v1985_v27 = vunpack.i.h.bf16 %v1983_v25  ;;  %v1984_v28 = vunpack.i.l.bf16 %v1983_v25  ;;  %1896 = vmatprep.subr.msk.bf16.mxu1 %vm2272_vm2, %v1894_v24 }
 0x198   :  { %v1904_v29 = vpack.c.bf16 %v1985_v27, %v1984_v28 }
 0x199   :  { %v771_v32 = vpop.permute.xlu0 %770 }
 0x19a   :  { %1783 = vmatmul.mubr.msk.f32.vlgmr.msra.gmra.mrb[2].mxu1 %vm200_vm1, %v2263_v15 }
 0x19b   :  { %1899 = vmatpush3.bf16.xpose.msk.msra.mxu1 %vm2272_vm2, %v1894_v24  ;;  %1796 = vmatprep.mubr.msk.f32.mxu1 %vm200_vm1, %v398_v26 }
 0x19c   :  { %1906 = vmatprep.subr.msk.bf16.mxu1 %vm2272_vm2, %v1904_v29 }
 0x1a2   :  { %1797 = vmatmul.mubr.msk.f32.vlgmr.msra.gmra.mrb[4].mxu1 %vm200_vm1, %v400_v30 }
 0x1a3   :  { %1909 = vmatpush3.bf16.xpose.msk.msra.mxu1 %vm2272_vm2, %v1904_v29  ;;  %1820 = vmatprep.mubr.msk.f32.mxu1 %vm200_vm1, %v769_v31 }
 0x1aa   :  { %1821 = vmatmul.mubr.msk.f32.vlgmr.msra.gmra.mrb[6].mxu1 %vm200_vm1, %v771_v32 }
 0x26d   :  { %v1784_v43 = vpop.f32.mrb[2].mxu1 }
 0x26e   :  { %v283_v44 = vadd.f32 %v1784_v43, %v2294_v41  ;;  %v277_v45 = vpop.f32.mrb[3].mxu1 }
 0x26f   :  { %v278_v46 = vadd.f32 %v277_v45, %v2296_v42 }
 0x270   :  { %v290_v47 = vsel %vm286_vm5, %v283_v44, -inf }
 0x271   :  { %291 = vmax.xlane.f32.xlu0 %v290_v47  ;;  %v287_v48 = vsel %vm286_vm5, %v278_v46, -inf }
 0x272   :  { %288 = vmax.xlane.f32.xlu1 %v287_v48 }
 0x275   :  { %v1798_v49 = vpop.f32.mrb[4].mxu1 }
 0x276   :  { %v485_v50 = vadd.f32 %v1798_v49, %v2294_v41  ;;  %v479_v51 = vpop.f32.mrb[5].mxu1 }
 0x277   :  { %v480_v52 = vadd.f32 %v479_v51, %v2296_v42 }
 0x278   :  { %v491_v53 = vsel %vm286_vm5, %v485_v50, -inf }
 0x279   :  { %492 = vmax.xlane.f32.xlu1 %v491_v53  ;;  %v488_v54 = vsel %vm286_vm5, %v480_v52, -inf }
 0x27a   :  { %489 = vmax.xlane.f32.xlu0 %v488_v54 }
 0x27d   :  { %v1822_v55 = vpop.f32.mrb[6].mxu1 }
 0x27e   :  { %v850_v56 = vpop.f32.mrb[7].mxu1  ;;  %v856_v24 = vadd.f32 %v1822_v55, %v2294_v41 }
 0x27f   :  { %v851_v23 = vadd.f32 %v850_v56, %v2296_v42 }
 0x280   :  { %v862_v26 = vsel %vm286_vm5, %v856_v24, -inf }
 0x281   :  { %v859_v25 = vsel %vm286_vm5, %v851_v23, -inf }
 0x2fe   :  { %v292_v57 = vpop.xlane.xlu0 %291 }
 0x2ff   :  { %v294_v58 = vsub.f32 %v283_v44, %v292_v57  ;;  %v289_v59 = vpop.xlane.xlu1 %288 }
 0x300   :  { %v293_v60 = vsub.f32 %v278_v46, %v289_v59 }
 0x301   :  { %v297_v61 = vmul.f32 1.442695, %v294_v58 }
 0x302   :  { %v295_v62 = vmul.f32 1.442695, %v293_v60 }
 0x303   :  { %2021 = vpow2.f32 %v297_v61 }
 0x304   :  { %2023 = vpow2.f32 %v295_v62 }
 0x306   :  { %v493_v63 = vpop.xlane.xlu1 %492 }
 0x307   :  { %v495_v3 = vsub.f32 %v485_v50, %v493_v63  ;;  %v490_v6 = vpop.xlane.xlu0 %489 }
 0x308   :  { %v494_v8 = vsub.f32 %v480_v52, %v490_v6 }
 0x309   :  { %v498_v9 = vmul.f32 1.442695, %v495_v3 }
 0x30a   :  { %v496_v10 = vmul.f32 1.442695, %v494_v8 }
 0x30b   :  { %2025 = vpow2.f32 %v498_v9 }
 0x30c   :  { %2027 = vpow2.f32 %v496_v10 }
 0x30d   :  { %v2022_v11 = vpop.eup %2021 }
 0x30e   :  { %v2024_v12 = vpop.eup %2023  ;;  %v302_v16 = vsel %vm286_vm5, %v2022_v11, 0.0 }
 0x30f   :  { %303 = vadd.xlane.f32.xlu1 %v302_v16  ;;  %v299_v17 = vsel %vm286_vm5, %v2024_v12, 0.0 }
 0x310   :  { %300 = vadd.xlane.f32.xlu0 %v299_v17 }
 0x315   :  { %v2308_v18 = vpop.eup %2025 }
 0x316   :  { %v2028_v20 = vpop.eup %2027  ;;  %v503_v21 = vsel %vm286_vm5, %v2308_v18, 0.0 }
 0x317   :  { %504 = vadd.xlane.f32.xlu1 %v503_v21  ;;  %v500_v22 = vsel %vm286_vm5, %v2028_v20, 0.0 }
 0x318   :  { %501 = vadd.xlane.f32.xlu0 %v500_v22 }
 0x328   :  { %1992 = vrot.lane.b32.xlu1 %v2255_v13, %s2168_s27 }
 0x32c   :  { %1997 = vrot.lane.b32.xlu1 %v2255_v13, %s2169_s28 }
 0x32e   :  { %1987 = vrot.lane.b32.xlu0 %v2255_v13, %s2170_s29 }
 0x330   :  { %1058 = vrot.lane.b32.xlu1 %v2263_v15, %s2171_s30 }
 0x332   :  { %1056 = vrot.lane.b32.xlu0 %v2257_v14, %s2171_s30 }
 0x351   :  { %860 = vmax.xlane.f32.xlu0 %v859_v25 }
 0x354   :  { %863 = vmax.xlane.f32.xlu1 %v862_v26 }
 0x365   :  { %599 = vrot.lane.b32.xlu1 %v2237_v1, %s2172_s4 }
 0x369   :  { %2002 = vrot.lane.b32.xlu1 %v2255_v13, %s2173_s5 }
 0x39c   :  { %v304_v14 = vpop.xlane.xlu1 %303 }
 0x39d   :  { %v301_v15 = vpop.xlane.xlu0 %300 }
 0x39e   :  { %2029 = vrcp.f32 %v301_v15 }
 0x39f   :  { %2031 = vrcp.f32 %v304_v14 }
 0x3a4   :  { %v505_v27 = vpop.xlane.xlu1 %504 }
 0x3a5   :  { %v502_v28 = vpop.xlane.xlu0 %501 }
 0x3a6   :  { %2033 = vrcp.f32 %v502_v28 }
 0x3a7   :  { %2035 = vrcp.f32 %v505_v27 }
 0x3a8   :  { %v2030_v29 = vpop.eup %2029  ;;  %v1993_v30 = vpop.permute.xlu1 %1992 }
 0x3a9   :  { %v1988_v31 = vpop.permute.xlu0 %1987  ;;  %v306_v32 = vmul.f32 %v2030_v29, %v2024_v12  ;;  %v1995_v33 = vunpack.i.h.bf16 %v1993_v30  ;;  %v1994_v34 = vunpack.i.l.bf16 %v1993_v30  ;;  %v2032_v38 = vpop.eup %2031 }
 0x3aa   :  { %v1990_v35 = vunpack.i.h.bf16 %v1988_v31  ;;  %v1989_v36 = vunpack.i.l.bf16 %v1988_v31  ;;  %v308_v47 = vmul.f32 %v2032_v38, %v2022_v11 }
 0x3ab   :  { %1789 = vmatprep.mubr.msk.f32.mxu0 %vm286_vm5, %v306_v32  ;;  %v1900_v44 = vpack.c.bf16 %v1995_v33, %v1994_v34 }
 0x3ac   :  { %v1998_v1 = vpop.permute.xlu1 %1997  ;;  %v1890_v37 = vpack.c.bf16 %v1990_v35, %v1989_v36 }
 0x3ad   :  { %v2000_v39 = vunpack.i.h.bf16 %v1998_v1  ;;  %v1999_v40 = vunpack.i.l.bf16 %v1998_v1  ;;  %v1057_v43 = vpop.permute.xlu0 %1056 }
 0x3ae   :  { %1891 = vmatprep.subr.bf16.mxu0 %v1890_v37  ;;  %1839 = vmatprep.mubr.msk.f32.mxu1 %vm200_vm1, %v1057_v43 }
 0x3af   :  { %v1914_v45 = vpack.c.bf16 %v2000_v39, %v1999_v40  ;;  %1893 = vmatpush3.bf16.msra.mxu0 %v1890_v37 }
 0x3b0   :  { %v2034_v46 = vpop.eup %2033  ;;  %1901 = vmatprep.subr.bf16.mxu0 %v1900_v44  ;;  %v1059_v51 = vpop.permute.xlu1 %1058 }
 0x3b1   :  { %v2036_v48 = vpop.eup %2035  ;;  %1916 = vmatprep.subr.msk.bf16.mxu1 %vm2272_vm2, %v1914_v45  ;;  %v507_v49 = vmul.f32 %v2034_v46, %v2028_v20 }
 0x3b2   :  { %1790 = vmatmul.mubr.msk.f32.vlgmr.msra.gmra.mrb[0].mxu0 %vm286_vm5, %v308_v47  ;;  %1919 = vmatpush3.bf16.xpose.msk.msra.mxu1 %vm2272_vm2, %v1914_v45  ;;  %v509_v50 = vmul.f32 %v2036_v48, %v2308_v18  ;;  %v1690_v48 = vld [vmem:[#allocation7 + $0x1] ss:$0 sm:$0xff] }
 0x3b3   :  { %1903 = vmatpush3.bf16.msra.mxu0 %v1900_v44  ;;  %1803 = vmatprep.mubr.msk.f32.mxu0 %vm286_vm5, %v507_v49 }
 0x3b6   :  { %1804 = vmatmul.mubr.msk.f32.vlgmr.msra.gmra.mrb[2].mxu0 %vm286_vm5, %v509_v50 }
 0x3b9   :  { %1840 = vmatmul.mubr.msk.f32.vlgmr.msra.gmra.mrb[8].mxu1 %vm200_vm1, %v1059_v51 }
 0x3de   :  { %v861_v52 = vpop.xlane.xlu0 %860 }
 0x3df   :  { %v865_v53 = vsub.f32 %v851_v23, %v861_v52 }
 0x3e1   :  { %v864_v54 = vpop.xlane.xlu1 %863  ;;  %v867_v56 = vmul.f32 1.442695, %v865_v53 }
 0x3e2   :  { %v866_v55 = vsub.f32 %v856_v24, %v864_v54 }
 0x3e4   :  { %v869_v57 = vmul.f32 1.442695, %v866_v55 }
 0x3e5   :  { %v600_v58 = vpop.permute.xlu1 %599 }
 0x3e6   :  { %2037 = vpow2.f32 %v869_v57  ;;  %1806 = vmatprep.subr.mxu0 %v600_v58 }
 0x3e7   :  { %1807 = vmatpush3.msra.mxu0 %v600_v58  ;;  %2039 = vpow2.f32 %v867_v56 }
 0x3e9   :  { %v2003_v3 = vpop.permute.xlu1 %2002 }
 0x3ea   :  { %v2005_v10 = vunpack.i.h.bf16 %v2003_v3  ;;  %v2004_v11 = vunpack.i.l.bf16 %v2003_v3 }
 0x3ec   :  { %v1910_v17 = vpack.c.bf16 %v2005_v10, %v2004_v11  ;;  %v1397_v10 = vld [vmem:[#allocation5 + $0x38] sm:$0xff] }
 0x3f0   :  { %v2038_v19 = vpop.eup %2037 }
 0x3f1   :  { %v874_v59 = vsel %vm286_vm5, %v2038_v19, 0.0  ;;  %v2040_v60 = vpop.eup %2039 }
 0x3f2   :  { %875 = vadd.xlane.f32.xlu0 %v874_v59  ;;  %v871_v61 = vsel %vm286_vm5, %v2040_v60, 0.0 }
 0x3f6   :  { %872 = vadd.xlane.f32.xlu0 %v871_v61 }
 0x40c   :  { %684 = vrot.lane.b32.xlu0 %v2235_v0, %s2172_s4 }
 0x47f   :  { %v876_v62 = vpop.xlane.xlu0 %875 }
 0x483   :  { %v873_v63 = vpop.xlane.xlu0 %872 }
 0x484   :  { %2041 = vrcp.f32 %v873_v63 }
 0x485   :  { %v1791_v6 = vpop.f32.mrb[0].mxu0  ;;  %2043 = vrcp.f32 %v876_v62 }
 0x486   :  { %v387_v8 = vpop.f32.mrb[1].mxu0 }
 0x487   :  { %v685_v9 = vpop.permute.xlu0 %684 }
 0x488   :  { %1811 = vmatprep.subr.mxu0 %v685_v9 }
 0x489   :  { %v1805_v12 = vpop.f32.mrb[2].mxu0 }
 0x48a   :  { %v588_v16 = vpop.f32.mrb[3].mxu0 }
 0x48b   :  { %1808 = vmatprep.mubr.msk.f32.mxu0 %vm200_vm1, %v588_v16 }
 0x48c   :  { %1809 = vmatmul.mubr.msk.f32.vlgmr.msra.gmra.mrb[4].mxu0 %vm200_vm1, %v1805_v12  ;;  %v1841_v18 = vpop.f32.mrb[8].mxu1 }
 0x48d   :  { %1812 = vmatpush3.msra.mxu0 %v685_v9  ;;  %v1144_v0 = vadd.f32 %v1841_v18, %v2294_v41  ;;  %1813 = vmatprep.mubr.msk.f32.mxu0 %vm200_vm1, %v387_v8  ;;  %v1138_v20 = vpop.f32.mrb[9].mxu1  ;;  %v1396_v9 = vld [vmem:[#allocation5 + $0x28] sm:$0xff] }
 0x48e   :  { %1911 = vmatprep.subr.bf16.mxu0 %v1910_v17  ;;  %v1139_v21 = vadd.f32 %v1138_v20, %v2296_v42  ;;  %v2042_v23 = vpop.eup %2041  ;;  %v1928_v11 = vpack.c.bf16 %v1397_v10, %v1396_v9  ;;  %v2016_v16 = vpack.i.bf16 %v1397_v10, %v1396_v9 }
 0x48f   :  { %v1150_v22 = vsel %vm286_vm5, %v1144_v0, -inf  ;;  %v2044_v25 = vpop.eup %2043  ;;  %v878_v26 = vmul.f32 %v2042_v23, %v2040_v60 }
 0x490   :  { %1151 = vmax.xlane.f32.xlu0 %v1150_v22  ;;  %v1147_v24 = vsel %vm286_vm5, %v1139_v21, -inf  ;;  %v880_v41 = vmul.f32 %v2044_v25, %v2038_v19 }
 0x491   :  { %1148 = vmax.xlane.f32.xlu1 %v1147_v24 }
 0x494   :  { %1814 = vmatmul.mubr.msk.f32.vlgmr.msra.gmra.mrb[4].mxu0 %vm200_vm1, %v1791_v6  ;;  %v1395_v6 = vld [vmem:[#allocation5 + $0x18] sm:$0xff] }
 0x495   :  { %1913 = vmatpush3.bf16.msra.mxu0 %v1910_v17  ;;  %1827 = vmatprep.mubr.msk.f32.mxu0 %vm286_vm5, %v878_v26  ;;  %v1691_v26 = vld [vmem:[#allocation7 + $0x2] ss:$0 sm:$0xff] }
 0x498   :  { %1828 = vmatmul.mubr.msk.f32.vlgmr.msra.gmra.mrb[6].mxu0 %vm286_vm5, %v880_v41 }
 0x51d   :  { %v1152_v15 = vpop.xlane.xlu0 %1151 }
 0x51e   :  { %v1154_v14 = vsub.f32 %v1144_v0, %v1152_v15  ;;  %v1149_v42 = vpop.xlane.xlu1 %1148 }
 0x51f   :  { %v1153_v27 = vsub.f32 %v1139_v21, %v1149_v42 }
 0x520   :  { %v1157_v28 = vmul.f32 1.442695, %v1154_v14 }
 0x521   :  { %v1155_v29 = vmul.f32 1.442695, %v1153_v27 }
 0x522   :  { %2045 = vpow2.f32 %v1157_v28  ;;  %v1692_v28 = vld [vmem:[#allocation7 + $0x3] ss:$0 sm:$0xff] }
 0x523   :  { %2047 = vpow2.f32 %v1155_v29 }
 0x52c   :  { %v2046_v30 = vpop.eup %2045 }
 0x52d   :  { %v2048_v31 = vpop.eup %2047  ;;  %v1162_v32 = vsel %vm286_vm5, %v2046_v30, 0.0 }
 0x52e   :  { %1163 = vadd.xlane.f32.xlu1 %v1162_v32  ;;  %v1159_v33 = vsel %vm286_vm5, %v2048_v31, 0.0 }
 0x52f   :  { %1160 = vadd.xlane.f32.xlu0 %v1159_v33 }
 0x53f   :  { %2007 = vrot.lane.b32.xlu1 %v2255_v13, %s2174_s6 }
 0x543   :  { %1258 = vrot.lane.b32.xlu1 %v2243_v4, %s2172_s4 }
 0x545   :  { %970 = vrot.lane.b32.xlu0 %v2239_v2, %s2172_s4 }
 0x56b   :  { %v1829_v34 = vpop.f32.mrb[6].mxu0 }
 0x56c   :  { %v959_v35 = vpop.f32.mrb[7].mxu0 }
 0x56d   :  { %1832 = vmatprep.mubr.msk.f32.mxu0 %vm200_vm1, %v959_v35 }
 0x5bb   :  { %v1164_v36 = vpop.xlane.xlu1 %1163 }
 0x5bc   :  { %2049 = vrcp.f32 %v1164_v36  ;;  %v1161_v1 = vpop.xlane.xlu0 %1160 }
 0x5bd   :  { %2051 = vrcp.f32 %v1161_v1  ;;  %v1693_v1 = vld [vmem:[#allocation7 + $0x4] ss:$0 sm:$0xff] }
 0x5bf   :  { %v2008_v37 = vpop.permute.xlu1 %2007 }
 0x5c0   :  { %v2010_v38 = vunpack.i.h.bf16 %v2008_v37  ;;  %v2009_v39 = vunpack.i.l.bf16 %v2008_v37  ;;  %v971_v40 = vpop.permute.xlu0 %970 }
 0x5c1   :  { %1830 = vmatprep.subr.mxu0 %v971_v40 }
 0x5c2   :  { %v1920_v13 = vpack.c.bf16 %v2010_v38, %v2009_v39  ;;  %1831 = vmatpush3.msra.mxu0 %v971_v40 }
 0x5c3   :  { %1833 = vmatmul.mubr.msk.f32.vlgmr.msra.gmra.mrb[4].mxu0 %vm200_vm1, %v1829_v34  ;;  %v1259_v4 = vpop.permute.xlu1 %1258 }
 0x5c4   :  { %1921 = vmatprep.subr.bf16.mxu0 %v1920_v13 }
 0x5c5   :  { %1923 = vmatpush3.bf16.msra.mxu0 %v1920_v13 }
 0x5c6   :  { %v2050_v2 = vpop.eup %2049  ;;  %1849 = vmatprep.subr.mxu0 %v1259_v4 }
 0x5c7   :  { %v2052_v43 = vpop.eup %2051  ;;  %v1168_v45 = vmul.f32 %v2050_v2, %v2046_v30  ;;  %v1696_v2 = vld [vmem:[#allocation7 + $0x5] ss:$0 sm:$0xff] }
 0x5c8   :  { %v1166_v44 = vmul.f32 %v2052_v43, %v2048_v31 }
 0x5ca   :  { %1846 = vmatprep.mubr.msk.f32.mxu0 %vm286_vm5, %v1166_v44 }
 0x5cb   :  { %1847 = vmatmul.mubr.msk.f32.vlgmr.msra.gmra.mrb[8].mxu0 %vm286_vm5, %v1168_v45 }
 0x5cc   :  { %1850 = vmatpush3.msra.mxu0 %v1259_v4 }
 0x69e   :  { %v1848_v46 = vpop.f32.mrb[8].mxu0 }
 0x69f   :  { %v1247_v47 = vpop.f32.mrb[9].mxu0 }
 0x6a0   :  { %1851 = vmatprep.mubr.msk.f32.mxu0 %vm200_vm1, %v1247_v47 }
 0x6a1   :  { %1852 = vmatmul.mubr.msk.f32.vlgmr.msra.gmra.mrb[4].mxu0 %vm200_vm1, %v1848_v46 }
 0x774   :  { %v1853_v49 = vpop.f32.mrb[4].mxu0 }
 0x775   :  { %v1350_v50 = vadd.f32 %v1853_v49, %v1690_v48  ;;  %v1333_v51 = vpop.f32.mrb[5].mxu0 }
 0x776   :  { %v1349_v52 = vadd.f32 %v1690_v48, %v1333_v51 }
 0x777   :  { %v1352_v53 = vadd.f32 %v1350_v50, %v2251_v7 }
 0x778   :  { %v1351_v54 = vadd.f32 %v1349_v52, %v2245_v5  ;;  %v1394_v5 = vld [vmem:[#allocation5 + $0x8] sm:$0xff] }
 0x779   :  { %v1358_v55 = vsel %vm65_vm0, %v1352_v53, 0.0  ;;  %v1924_v8 = vpack.c.bf16 %v1395_v6, %v1394_v5  ;;  %v2011_v12 = vpack.i.bf16 %v1395_v6, %v1394_v5  ;;  %v1703_v6 = vld [vmem:[#allocation7 + $0x6] ss:$0 sm:$0xff] }
 0x77a   :  { %1359 = vadd.xlane.f32.xlu1 %v1358_v55  ;;  %v1355_v56 = vsel %vm65_vm0, %v1351_v54, 0.0 }
 0x77b   :  { %1356 = vadd.xlane.f32.xlu0 %v1355_v56  ;;  %1925 = vmatprep.subr.bf16.mxu1 %v1924_v8 }
 0x77c   :  { %1927 = vmatpush3.bf16.msra.mxu1 %v1924_v8 }
 0x77d   :  { %1929 = vmatprep.subr.bf16.mxu1 %v1928_v11 }
 0x780   :  { %1931 = vmatpush3.bf16.msra.mxu1 %v1928_v11  ;;  %v1704_v11 = vld [vmem:[#allocation7 + $0x7] ss:$0 sm:$0xff] }
 0x78b   :  { %2012 = vrot.lane.b32.xlu1 %v2011_v12, %s2170_s29 }
 0x807   :  { %v1360_v57 = vpop.xlane.xlu1 %1359 }
 0x808   :  { %v1363_v58 = vmul.f32 0.03125, %v1360_v57  ;;  %v1357_v19 = vpop.xlane.xlu0 %1356 }
 0x809   :  { %v1362_v59 = vmul.f32 0.03125, %v1357_v19 }
 0x80a   :  { %v1365_v60 = vsub.f32 %v1352_v53, %v1363_v58 }
 0x80b   :  { %v1364_v61 = vsub.f32 %v1351_v54, %v1362_v59  ;;  %v2013_v23 = vpop.permute.xlu1 %2012 }
 0x80c   :  { %v1367_v3 = vmul.f32 %v1365_v60, %v1365_v60  ;;  %v2015_v41 = vunpack.i.h.bf16 %v2013_v23  ;;  %v2014_v15 = vunpack.i.l.bf16 %v2013_v23 }
 0x80d   :  { %v1366_v62 = vmul.f32 %v1364_v61, %v1364_v61 }
 0x80e   :  { %v1371_v7 = vsel %vm65_vm0, %v1367_v3, 0.0  ;;  %v1932_v29 = vpack.c.bf16 %v2015_v41, %v2014_v15 }
 0x80f   :  { %v1368_v63 = vsel %vm65_vm0, %v1366_v62, 0.0 }
 0x810   :  { %1369 = vadd.xlane.f32.xlu0 %v1368_v63  ;;  %1934 = vmatprep.subr.msk.bf16.mxu0 %vm1933_vm7, %v1932_v29 }
 0x811   :  { %1937 = vmatpush3.bf16.xpose.msk.msra.mxu0 %vm1933_vm7, %v1932_v29 }
 0x814   :  { %1372 = vadd.xlane.f32.xlu0 %v1371_v7 }
 0x82a   :  { %2017 = vrot.lane.b32.xlu0 %v2016_v16, %s2170_s29 }
 0x89d   :  { %v1370_v17 = vpop.xlane.xlu0 %1369 }
 0x89e   :  { %v1374_v18 = vmul.f32 0.03125, %v1370_v17 }
 0x8a0   :  { %v1376_v0 = vadd.f32 1e-05, %v1374_v18 }
 0x8a1   :  { %v1373_v20 = vpop.xlane.xlu0 %1372 }
 0x8a2   :  { %2053 = vrsqrt.f32 %v1376_v0  ;;  %v1375_v21 = vmul.f32 0.03125, %v1373_v20 }
 0x8a4   :  { %v1377_v22 = vadd.f32 1e-05, %v1375_v21 }
 0x8a5   :  { %v2018_v24 = vpop.permute.xlu0 %2017 }
 0x8a6   :  { %2055 = vrsqrt.f32 %v1377_v22  ;;  %v2020_v14 = vunpack.i.h.bf16 %v2018_v24  ;;  %v2019_v42 = vunpack.i.l.bf16 %v2018_v24 }
 0x8a8   :  { %v1938_v30 = vpack.c.bf16 %v2020_v14, %v2019_v42 }
 0x8aa   :  { %1940 = vmatprep.subr.msk.bf16.mxu0 %vm1933_vm7, %v1938_v30 }
 0x8ab   :  { %1943 = vmatpush3.bf16.xpose.msk.msra.mxu0 %vm1933_vm7, %v1938_v30 }
 0x8ac   :  { %v2054_v25 = vpop.eup %2053 }
 0x8ad   :  { %v1380_v27 = vmul.f32 %v2054_v25, %v1364_v61 }
 0x8af   :  { %v1386_v31 = vmul.f32 %v1691_v26, %v1380_v27 }
 0x8b0   :  { %v2056_v32 = vpop.eup %2055 }
 0x8b1   :  { %v1381_v33 = vmul.f32 %v2056_v32, %v1365_v60  ;;  %v1392_v34 = vadd.f32 %v1692_v28, %v1386_v31 }
 0x8b3   :  { %v1387_v35 = vmul.f32 %v1691_v26, %v1381_v33  ;;  %1862 = vmatprep.mubr.msk.f32.mxu1 %vm65_vm0, %v1392_v34 }
 0x8b5   :  { %v1393_v36 = vadd.f32 %v1692_v28, %v1387_v35 }
 0x8b7   :  { %1863 = vmatmul.mubr.msk.f32.vlgmr.msra.gmra.mrb[10].mxu1 %vm65_vm0, %v1393_v36 }
 0x98a   :  { %v1864_v37 = vpop.f32.mrb[10].mxu1 }
 0x98b   :  { %v1481_v38 = vadd.f32 %v1864_v37, %v1693_v1  ;;  %v1475_v39 = vpop.f32.mrb[11].mxu1 }
 0x98c   :  { %v1476_v40 = vadd.f32 %v1693_v1, %v1475_v39 }
 0x98d   :  { %v1485_v4 = vmax.f32 %v1481_v38, 0.0 }
 0x98e   :  { %v1484_v13 = vmax.f32 %v1476_v40, 0.0 }
 0x990   :  { %1873 = vmatprep.mubr.msk.f32.mxu0 %vm1503_vm6, %v1484_v13 }
 0x991   :  { %1874 = vmatmul.mubr.msk.f32.vlgmr.msra.gmra.mrb[10].mxu0 %vm1503_vm6, %v1485_v4 }
 0xa64   :  { %v1875_v43 = vpop.f32.mrb[10].mxu0 }
 0xa65   :  { %v1590_v44 = vadd.f32 %v1875_v43, %v1696_v2  ;;  %v1584_v45 = vpop.f32.mrb[11].mxu0 }
 0xa66   :  { %v1585_v46 = vadd.f32 %v1696_v2, %v1584_v45 }
 0xa67   :  { %v1594_v47 = vadd.f32 %v1590_v44, %v1393_v36 }
 0xa68   :  { %v1593_v48 = vadd.f32 %v1585_v46, %v1392_v34 }
 0xa69   :  { %v1600_v49 = vsel %vm65_vm0, %v1594_v47, 0.0 }
 0xa6a   :  { %1601 = vadd.xlane.f32.xlu0 %v1600_v49  ;;  %v1597_v50 = vsel %vm65_vm0, %v1593_v48, 0.0 }
 0xa6b   :  { %1598 = vadd.xlane.f32.xlu1 %v1597_v50 }
 0xaf7   :  { %v1602_v51 = vpop.xlane.xlu0 %1601 }
 0xaf8   :  { %v1604_v52 = vmul.f32 0.03125, %v1602_v51  ;;  %v1599_v53 = vpop.xlane.xlu1 %1598 }
 0xaf9   :  { %v1603_v54 = vmul.f32 0.03125, %v1599_v53 }
 0xafa   :  { %v1606_v55 = vsub.f32 %v1594_v47, %v1604_v52 }
 0xafb   :  { %v1605_v56 = vsub.f32 %v1593_v48, %v1603_v54 }
 0xafc   :  { %v1608_v57 = vmul.f32 %v1606_v55, %v1606_v55 }
 0xafd   :  { %v1607_v58 = vmul.f32 %v1605_v56, %v1605_v56 }
 0xafe   :  { %v1612_v19 = vsel %vm65_vm0, %v1608_v57, 0.0 }
 0xaff   :  { %1613 = vadd.xlane.f32.xlu0 %v1612_v19  ;;  %v1609_v59 = vsel %vm65_vm0, %v1607_v58, 0.0 }
 0xb00   :  { %1610 = vadd.xlane.f32.xlu1 %v1609_v59 }
 0xb8c   :  { %v1614_v60 = vpop.xlane.xlu0 %1613 }
 0xb8d   :  { %v1616_v61 = vmul.f32 0.03125, %v1614_v60  ;;  %v1611_v62 = vpop.xlane.xlu1 %1610 }
 0xb8e   :  { %v1615_v63 = vmul.f32 0.03125, %v1611_v62 }
 0xb8f   :  { %v1618_v3 = vadd.f32 1e-05, %v1616_v61 }
 0xb90   :  { %v1617_v7 = vadd.f32 1e-05, %v1615_v63 }
 0xb91   :  { %2057 = vrsqrt.f32 %v1618_v3 }
 0xb92   :  { %2059 = vrsqrt.f32 %v1617_v7 }
 0xb9b   :  { %v2058_v5 = vpop.eup %2057 }
 0xb9c   :  { %v2060_v8 = vpop.eup %2059  ;;  %v1622_v9 = vmul.f32 %v2058_v5, %v1606_v55 }
 0xb9d   :  { %v1621_v10 = vmul.f32 %v2060_v8, %v1605_v56 }
 0xb9e   :  { %v1628_v12 = vmul.f32 %v1703_v6, %v1622_v9 }
 0xb9f   :  { %v1627_v16 = vmul.f32 %v1703_v6, %v1621_v10 }
 0xba0   :  { %v1634_v17 = vadd.f32 %v1704_v11, %v1628_v12 }
 0xba1   :  { %v1633_v18 = vadd.f32 %v1704_v11, %v1627_v16 }
 0xba2   :  { %1636 = vst.msk [vmem:[#allocation8 + $0x8] sm:$0xff] %vm65_vm0, %v1634_v17 }
 0xba3   :  { %1635 = vst.msk [vmem:[#allocation8] sm:$0xff] %vm65_vm0, %v1633_v18 }
 0xba4   :  { %2138 = shalt.err (!%p2135_p0)
}
 0xba5   :  { %s2139_s13 = scalar_lea.hbm %s2402_s3, 256 }
 0xba6   :  { %p2140_p1 = scmp.ne.s32.totalorder %s2402_s3, %s2139_s13  ;;  %p2143_p2 = scmp.lt.u32.totalorder %s2139_s13, %s2402_s3 }
 0xba8   :  { %p2145_p3 = pnand %p2143_p2, %p2140_p1 }
 0xbaa   :  { %2148 = shalt.err (!%p2145_p3)
}
 0xbab   :  { %1648 = dma.vmem_to_hbm [thread:$0]  %s1643_s8, 256, %s2402_s3, [#allocation4], %s2159_s1, %s2159_s1, %s2160_s9  }
 0xbac   :  { %2153 = dma.done.wait [#allocation4], 256  }
 0xbad   :  { %2154 = vsyncadd [#allocation4], 4294967040 }
 0xbae   :  { %1652 = vsyncpa [#allocation3], 1 }
 0xbaf   :  { %1653 = vsyncpa [#allocation6], 1 }
 0xbb0   :  { %1654 = vsyncpa [#allocation4], 1 }

</bundles_post_ra>
